<compile_context>
chip_gen: v5e
topology: v5e:2x2
jax: 0.10.0
libtpu: 0.0.40
codegen_flags: <defaults>
</compile_context>

<pallas_src>
import math

import jax
import jax.numpy as jnp
from jax import lax
from jax.experimental import pallas as pl
from jax.experimental.pallas import tpu as pltpu


def _mlp_kernel(x_ref, w1_ref, b1_ref, w2_ref, b2_ref, o_ref):
    # x_ref:(tm,in)  w1_ref:(hid,in)  b1_ref:(hid,1)
    # w2_ref:(out,hid)  b2_ref:(out,1)  o_ref:(out,tm)
    x = x_ref[...].astype(w1_ref.dtype)            # dtype cast (if any) on the VPU
    # h_t = W1 @ x^T : contract over in_ch (last dim of both operands) -> (hid, tm)
    h = lax.dot_general(w1_ref[...], x, (((1,), (1,)), ((), ())),
                        preferred_element_type=jnp.float32)
    h = jnp.maximum(h + b1_ref[...], 0.0)          # f32 epilogue, lane-dense
    # y_t = W2 @ h_t -> (out, tm)
    y = jnp.dot(w2_ref[...], h.astype(w2_ref.dtype),
                preferred_element_type=jnp.float32)
    o_ref[...] = (y + b2_ref[...]).astype(o_ref.dtype)   # lane-dense unmasked store


def main_edge_net_forward(x, w1, b1, w2, b2, *, tm=None, compute_dtype=None,
                          out_dtype=None, out_transposed=False):
    """MainEdgeNet forward: relu(x @ W1^T + b1) @ W2^T + b2.

    x : [N, in_ch]
    w1: [hidden, in_ch]   b1: [hidden]     (PyTorch nn.Linear native layout)
    w2: [out_ch, hidden]  b2: [out_ch]
    Returns [N, out_ch] (or [out_ch, N] if out_transposed=True, saving the
    trailing wrapper transpose when the consumer can take that layout).
    """
    n, in_ch = x.shape
    hidden = w1.shape[0]
    out_ch = w2.shape[0]

    compute_dtype = jnp.dtype(x.dtype if compute_dtype is None else compute_dtype)
    out_dtype = jnp.dtype(x.dtype if out_dtype is None else out_dtype)

    if tm is None:
        # Large tile amortizes the ~0.35us/grid-step overhead, but cap near
        # ceil(n/2) (rounded up to 128) so there are >=2 parallel grid steps
        # for the two v7x TensorCores.  Multiple of 128 keeps the (out_ch, tm)
        # output block lane-aligned.
        half_rows = (n + 1) // 2
        tm = min(2048, max(128, ((half_rows + 127) // 128) * 128))

    grid = (pl.cdiv(n, tm),)

    # Tiny, grid-resident params: cast/reshape in the wrapper (negligible).
    w1c = w1.astype(compute_dtype)
    w2c = w2.astype(compute_dtype)
    b1c = b1.reshape(hidden, 1).astype(jnp.float32)
    b2c = b2.reshape(out_ch, 1).astype(jnp.float32)

    cost = pl.CostEstimate(
        flops=2 * n * (in_ch * hidden + hidden * out_ch),
        transcendentals=0,
        bytes_accessed=(n * in_ch * x.dtype.itemsize                     # x
                        + (in_ch * hidden + hidden * out_ch) * compute_dtype.itemsize
                        + (hidden + out_ch) * 4                          # biases
                        + n * out_ch * out_dtype.itemsize))              # y

    out_t = pl.pallas_call(
        _mlp_kernel,
        out_shape=jax.ShapeDtypeStruct((out_ch, n), out_dtype),
        grid_spec=pl.GridSpec(
            grid=grid,
            in_specs=[
                pl.BlockSpec((tm, in_ch), lambda i: (i, 0)),        # x row tile
                pl.BlockSpec((hidden, in_ch), lambda i: (0, 0)),    # W1 (resident)
                pl.BlockSpec((hidden, 1), lambda i: (0, 0)),        # b1 column
                pl.BlockSpec((out_ch, hidden), lambda i: (0, 0)),   # W2 (resident)
                pl.BlockSpec((out_ch, 1), lambda i: (0, 0)),        # b2 column
            ],
            out_specs=pl.BlockSpec((out_ch, tm), lambda i: (0, i)),  # transposed out
        ),
        compiler_params=pltpu.CompilerParams(
            dimension_semantics=("parallel",)),
        cost_estimate=cost,
    )(x, w1c, b1c, w2c, b2c)

    return out_t if out_transposed else out_t.T


def init_params(key, in_channels, out_channels, hidden=64, dtype=jnp.float32):
    """PyTorch nn.Linear default init, native [out_features, in_features] layout."""
    k1, k2, k3, k4 = jax.random.split(key, 4)
    bound1 = 1.0 / math.sqrt(in_channels)
    bound2 = 1.0 / math.sqrt(hidden)
    w1 = jax.random.uniform(k1, (hidden, in_channels), dtype, -bound1, bound1)
    b1 = jax.random.uniform(k2, (hidden,), dtype, -bound1, bound1)
    w2 = jax.random.uniform(k3, (out_channels, hidden), dtype, -bound2, bound2)
    b2 = jax.random.uniform(k4, (out_channels,), dtype, -bound2, bound2)
    return w1, b1, w2, b2


if __name__ == "__main__":
    key = jax.random.PRNGKey(0)
    kx, kp = jax.random.split(key)

    # Small shapes consistent with the module; batch intentionally NOT a
    # multiple of the tile so the cdiv boundary block is exercised.
    batch = 200
    in_channels = 32
    out_channels = 16

    x = jax.random.normal(kx, (batch, in_channels), dtype=jnp.float32)
    w1, b1, w2, b2 = init_params(kp, in_channels, out_channels)

    ref = jnp.maximum(x @ w1.T + b1, 0.0) @ w2.T + b2

    # f32 path (tight reference check).
    out_f32 = jax.block_until_ready(main_edge_net_forward(x, w1, b1, w2, b2))
    assert out_f32.shape == (batch, out_channels)
    assert jnp.allclose(out_f32, ref, atol=1e-5, rtol=1e-5), "f32 mismatch"

    # bf16 compute path (x cast inside the kernel; f32 MXU accumulation).
    out_bf16 = jax.block_until_ready(
        main_edge_net_forward(x, w1, b1, w2, b2, compute_dtype=jnp.bfloat16))
    assert out_bf16.shape == (batch, out_channels)
    assert jnp.allclose(out_bf16, ref, atol=1e-1, rtol=1e-1), "bf16 mismatch"

    print("KERNEL_OK")
</pallas_src>

<mosaic_0001>
module attributes {stable_mosaic.version = 11 : i64} {
  func.func @_mlp_kernel(%arg0: i32, %arg1: memref<128x32xf32, #tpu.memory_space<vmem>>, %arg2: memref<64x32xf32, #tpu.memory_space<vmem>>, %arg3: memref<64x1xf32, #tpu.memory_space<vmem>>, %arg4: memref<16x64xf32, #tpu.memory_space<vmem>>, %arg5: memref<16x1xf32, #tpu.memory_space<vmem>>, %arg6: memref<16x128xf32, #tpu.memory_space<vmem>>) attributes {dimension_semantics = [#tpu.dimension_semantics<parallel>], iteration_bounds = array<i64: 2>, scalar_prefetch = 0 : i64, scratch_operands = 0 : i64, tpu.core_type = #tpu.core_type<tc>, window_params = [{transform_indices = @transform_0, window_bounds = array<i64: 128, 32>}, {pipeline_mode = #tpu.pipeline_mode<synchronous>, transform_indices = @transform_1, window_bounds = array<i64: 64, 32>}, {pipeline_mode = #tpu.pipeline_mode<synchronous>, transform_indices = @transform_2, window_bounds = array<i64: 64, 1>}, {pipeline_mode = #tpu.pipeline_mode<synchronous>, transform_indices = @transform_3, window_bounds = array<i64: 16, 64>}, {pipeline_mode = #tpu.pipeline_mode<synchronous>, transform_indices = @transform_4, window_bounds = array<i64: 16, 1>}, {transform_indices = @transform_5, window_bounds = array<i64: 16, 128>}]} {
    %c0 = arith.constant 0 : index
    %c0_0 = arith.constant 0 : index
    %0 = vector.load %arg1[%c0, %c0_0] : memref<128x32xf32, #tpu.memory_space<vmem>>, vector<128x32xf32>
    %c0_1 = arith.constant 0 : index
    %c0_2 = arith.constant 0 : index
    %1 = vector.load %arg2[%c0_1, %c0_2] : memref<64x32xf32, #tpu.memory_space<vmem>>, vector<64x32xf32>
    %cst = arith.constant dense<0.000000e+00> : vector<64x128xf32>
    %2 = tpu.matmul %1, %0, %cst {dimension_numbers = #tpu.dot_dimension_numbers<[1], [1], [0], [0], [0, 0, 1, 0], [], []>} : vector<64x32xf32>, vector<128x32xf32>, vector<64x128xf32> -> vector<64x128xf32>
    %c0_3 = arith.constant 0 : index
    %c0_4 = arith.constant 0 : index
    %3 = vector.load %arg3[%c0_3, %c0_4] : memref<64x1xf32, #tpu.memory_space<vmem>>, vector<64x1xf32>
    %4 = vector.broadcast %3 : vector<64x1xf32> to vector<64x128xf32>
    %5 = arith.addf %2, %4 : vector<64x128xf32>
    %cst_5 = arith.constant 0.000000e+00 : f32
    %6 = vector.broadcast %cst_5 : f32 to vector<64x128xf32>
    %7 = arith.maximumf %5, %6 : vector<64x128xf32>
    %c0_6 = arith.constant 0 : index
    %c0_7 = arith.constant 0 : index
    %8 = vector.load %arg4[%c0_6, %c0_7] : memref<16x64xf32, #tpu.memory_space<vmem>>, vector<16x64xf32>
    %cst_8 = arith.constant dense<0.000000e+00> : vector<16x128xf32>
    %9 = tpu.matmul %8, %7, %cst_8 {dimension_numbers = #tpu.dot_dimension_numbers<[1], [0], [0], [1], [0, 0, 1, 1], [], []>} : vector<16x64xf32>, vector<64x128xf32>, vector<16x128xf32> -> vector<16x128xf32>
    %c0_9 = arith.constant 0 : index
    %c0_10 = arith.constant 0 : index
    %10 = vector.load %arg5[%c0_9, %c0_10] : memref<16x1xf32, #tpu.memory_space<vmem>>, vector<16x1xf32>
    %11 = vector.broadcast %10 : vector<16x1xf32> to vector<16x128xf32>
    %12 = arith.addf %9, %11 : vector<16x128xf32>
    %c0_11 = arith.constant 0 : index
    %c0_12 = arith.constant 0 : index
    %13 = vector.load %arg6[%c0_11, %c0_12] : memref<16x128xf32, #tpu.memory_space<vmem>>, vector<16x128xf32>
    tpu.vector_store %arg6[%c0_11, %c0_12], %12 {strides = array<i32>} : memref<16x128xf32, #tpu.memory_space<vmem>>, vector<16x128xf32>,
    return
  }
  func.func @transform_0(%arg0: i32) -> (i32, i32) {
    %c0_i32 = arith.constant 0 : i32
    %c0_i32_0 = arith.constant 0 : i32
    return %arg0, %c0_i32 : i32, i32
  }
  func.func @transform_1(%arg0: i32) -> (i32, i32) {
    %c0_i32 = arith.constant 0 : i32
    %c0_i32_0 = arith.constant 0 : i32
    %c0_i32_1 = arith.constant 0 : i32
    return %c0_i32, %c0_i32_0 : i32, i32
  }
  func.func @transform_2(%arg0: i32) -> (i32, i32) {
    %c0_i32 = arith.constant 0 : i32
    %c0_i32_0 = arith.constant 0 : i32
    %c0_i32_1 = arith.constant 0 : i32
    return %c0_i32, %c0_i32_0 : i32, i32
  }
  func.func @transform_3(%arg0: i32) -> (i32, i32) {
    %c0_i32 = arith.constant 0 : i32
    %c0_i32_0 = arith.constant 0 : i32
    %c0_i32_1 = arith.constant 0 : i32
    return %c0_i32, %c0_i32_0 : i32, i32
  }
  func.func @transform_4(%arg0: i32) -> (i32, i32) {
    %c0_i32 = arith.constant 0 : i32
    %c0_i32_0 = arith.constant 0 : i32
    %c0_i32_1 = arith.constant 0 : i32
    return %c0_i32, %c0_i32_0 : i32, i32
  }
  func.func @transform_5(%arg0: i32) -> (i32, i32) {
    %c0_i32 = arith.constant 0 : i32
    %c0_i32_0 = arith.constant 0 : i32
    return %c0_i32, %arg0 : i32, i32
  }
}

</mosaic_0001>

<bundles_post_ra>
// kernel: tpu_custom_call.1
= control target key start
LH: loop header
LB: loop body
LE: loop exit
PB: predicated region body
PF: predicated region fallthrough
CT: control target
= control target key end

     0   :  { %10 = vsyncpa [#allocation3], 0  ;;  %s993_s0 = inlined_call_operand.vmem [shape: f32[200,32], index: 0, kind: input, shape index: {}]   ;;  %s994_s1 = inlined_call_operand.vmem [shape: f32[64,32], index: 1, kind: input, shape index: {}]   ;;  %s995_s2 = inlined_call_operand.vmem [shape: f32[64,1], index: 2, kind: input, shape index: {}]   ;;  %s996_s3 = inlined_call_operand.vmem [shape: f32[16,64], index: 3, kind: input, shape index: {}]   ;;  %s997_s4 = inlined_call_operand.vmem [shape: f32[16,1], index: 4, kind: input, shape index: {}]   ;;  %s998_s5 = inlined_call_operand.hbm [shape: f32[16,200], index: 5, kind: output, shape index: {}]  }
   0x1   :  { %12 = vsyncpa [#allocation3 + $0x1], 0  ;;  %s775_s18 = smov 0   ;;  %s777_s19 = smov 0  }
   0x2   :  { %s779_s20 = smov 0   ;;  %s781_s21 = smov 0  }
   0x3 LB: > { %s796_s22 = sadd.s32 4294967295, %s739_s21   ;;  %s562_s23 = sadd.s32 4294967294, %s739_s21   ;;  %s739_s21 = sphi %s781_s21, %s1004_s21   ;;  %s735_s20 = sphi %s779_s20, %s1003_s20   ;;  %s731_s19 = sphi %s777_s19, %s1002_s19   ;;  %s727_s18 = sphi %s775_s18, %s1001_s18  }
   0x4   : > { %s800_s24 = sadd.s32 1, %s739_s21   ;;  %s135_s25 = sadd.s32 1, %s735_s20 }
   0x5   : > { %s132_s26 = ssub.s32 %s739_s21, %s800_s24  ;;  %p145_p0 = scmp.ne.s32.totalorder %s735_s20, %s731_s19 }
   0x6   : > { %p133_p1 = scmp.eq.s32.totalorder %s132_s26, 0  ;;  %p146_p2 = scmp.eq.s32.totalorder %s796_s22, 1 }
   0x7   : > { %p151_p3 = scmp.ne.s32.totalorder %s731_s19, %s727_s18  ;;  %p152_p4 = scmp.eq.s32.totalorder %s562_s23, 1 }
   0x8   : > { %s811_s27 = scalar_select %p133_p1, %s735_s20, %s135_s25  }
   0x9   : > { %p813_p5 = por %p146_p2, %p145_p0  ;;  %p817_p6 = por %p152_p4, %p151_p3 }
   0xa   : > { %p565_p7 = scmp.ge.s32.totalorder %s739_s21, 1  ;;  %p199_p8 = scmp.lt.s32.totalorder %s739_s21, 3 }
   0xc   : > { %p200_p9 = pnand %p565_p7, %p199_p8 }
   0xd   : > { %s567_s30 = sshll.u32 (!%p200_p9), %s796_s22, 4  ;;  %s228_s23 = sand.u32 (!%p200_p9), 1, %s731_s19  }
   0xe   : > { %203 = sbr.rel (%p200_p9) target bundleno = 394 (0x18a), region = 40  ;;  %p236_p10 = scmp.lt.s32.totalorder (!%p200_p9), %s567_s30, 24 }
   0xf   : > { %s566_s25 = sshll.u32 (!%p200_p9), %s228_s23, 4  ;;  %s596_s26 = sshll.u32 (!%p200_p9), %s796_s22, 3 }
  0x10   : > { %s496_s7 = scalar_lea.hbm (!%p200_p9), %s998_s5, %s596_s26  ;;  %s230_s8 = scalar_lea.vmem (!%p200_p9), [#allocation2], %s566_s25 }
  0x11   : > { %s497_s10 = sshll.u32 (!%p200_p9), %s230_s8, 4  ;;  %s499_s11 = sshll.u32 (!%p200_p9), %s496_s7, 4  ;;  %s498_s10 = int_to_ptr.vmem [resolvable:$true] %s497_s10  ;;  %s500_s11 = int_to_ptr.hbm [resolvable:$true] %s499_s11 }
  0x12   : > { %s486_s12 = scalar_lea.sflag (!%p200_p9), [#allocation3], %s228_s23  ;;  %s691_s22 = sshra.s32 (!%p200_p9), %s500_s11, 4  ;;  %s692_s22 = int_to_ptr.hbm [resolvable:$true] %s691_s22 }
  0x13   : > { %s1006_s30 = smov (!%p236_p10, %s567_s30), 24  ;;  %vm317_vm0 = vcmask 261120   ;;  %v741_v9 = vmov 0   ;;  %v274_v10 = vld [vmem:[%s995_s2 + $0x28] sm:$0xff]  ;;  %v276_v11 = vld [vmem:[%s995_s2 + $0x38] sm:$0xff]  ;;  %v273_v14 = vld [vmem:[%s995_s2 + $0x20] sm:$0xff]  ;;  %p698_p0 = scmp.lt.s32.totalorder %s692_s22, %s998_s5 }
  0x14   : > { %s568_s6 = sshll.u32 %s1006_s30, 3  ;;  %675 = vset.pattern.permute.xlu1 %v741_v9  ;;  %674 = vset.pattern.permute.xlu0 %v741_v9  ;;  %v275_v15 = vld [vmem:[%s995_s2 + $0x30] sm:$0xff]  ;;  %v269_v18 = vld [vmem:[%s995_s2] sm:$0xff]  ;;  %v270_v19 = vld [vmem:[%s995_s2 + $0x8] sm:$0xff]  ;;  %vm453_vm1 = vcmask 523264   ;;  %s693_s13 = scalar_lea.hbm %s692_s22, 16 }
  0x15   : > { %s827_s9 = scalar_lea.vmem %s993_s0, %s568_s6  ;;  %676 = vset.pattern.permute.xlu2 %v741_v9  ;;  %304 = vperm.xlu1 %675, %v274_v10   ;;  %v442_v22 = vld [vmem:[%s997_s4 + $0x8] sm:$0xff]  ;;  %v272_v23 = vld [vmem:[%s995_s2 + $0x18] sm:$0xff]  ;;  %v261_v25 = vld [vmem:[%s994_s1] sm:$0xff]  ;;  %p694_p11 = scmp.ne.s32.totalorder %s692_s22, %s693_s13 }
  0x16   : > { %v260_v0 = vld [vmem:[%s827_s9 + $0x78] sm:$0xff]  ;;  %v259_v1 = vld [vmem:[%s827_s9 + $0x70] sm:$0xff]  ;;  %v258_v2 = vld [vmem:[%s827_s9 + $0x68] sm:$0xff]  ;;  %314 = vperm.xlu0 %674, %v276_v11   ;;  %294 = vperm.xlu2 %676, %v272_v23  }
  0x17   : > { %569 = vmatpush.xpose.msk.msra.mxu0 %vm317_vm0, %v260_v0  ;;  %600 = vmatpush.xpose.msk.msra.mxu3 %vm317_vm0, %v260_v0  ;;  %v257_v3 = vld [vmem:[%s827_s9 + $0x60] sm:$0xff]  ;;  %v256_v4 = vld [vmem:[%s827_s9 + $0x58] sm:$0xff]  ;;  %v255_v5 = vld [vmem:[%s827_s9 + $0x50] sm:$0xff]  ;;  %p695_p12 = pnand %p694_p11, %p813_p5 }
  0x18   : > { %599 = vmatpush.xpose.msk.msra.mxu2 %vm317_vm0, %v260_v0  ;;  %v254_v6 = vld [vmem:[%s827_s9 + $0x48] sm:$0xff]  ;;  %v253_v7 = vld [vmem:[%s827_s9 + $0x40] sm:$0xff]  ;;  %v252_v8 = vld [vmem:[%s827_s9 + $0x38] sm:$0xff] }
  0x19   : > { %v251_v12 = vld [vmem:[%s827_s9 + $0x30] sm:$0xff]  ;;  %v250_v13 = vld [vmem:[%s827_s9 + $0x28] sm:$0xff]  ;;  %v249_v16 = vld [vmem:[%s827_s9 + $0x20] sm:$0xff]  ;;  %p696_p13 = pneg %p695_p12 }
  0x1a   : > { %v248_v17 = vld [vmem:[%s827_s9 + $0x18] sm:$0xff]  ;;  %v247_v20 = vld [vmem:[%s827_s9 + $0x10] sm:$0xff]  ;;  %v246_v21 = vld [vmem:[%s827_s9 + $0x8] sm:$0xff] }
  0x1b   : > { %570 = vmatpush.xpose.msk.msra.mxu0 %vm317_vm0, %v259_v1  ;;  %602 = vmatpush.xpose.msk.msra.mxu3 %vm317_vm0, %v259_v1  ;;  %v245_v24 = vld [vmem:[%s827_s9] sm:$0xff]  ;;  %v266_v26 = vld [vmem:[%s994_s1 + $0x28] sm:$0xff]  ;;  %v271_v28 = vld [vmem:[%s995_s2 + $0x10] sm:$0xff]  ;;  %s697_s9 = scalar_lea.hbm %s998_s5, 32 }
  0x1c   : > { %601 = vmatpush.xpose.msk.msra.mxu2 %vm317_vm0, %v259_v1  ;;  %v265_v27 = vld [vmem:[%s994_s1 + $0x20] sm:$0xff]  ;;  %v262_v29 = vld [vmem:[%s994_s1 + $0x8] sm:$0xff]  ;;  %v267_v30 = vld [vmem:[%s994_s1 + $0x30] sm:$0xff]  ;;  %p699_p1 = scmp.lt.s32.totalorder %s697_s9, %s693_s13 }
  0x1d   : > { %299 = vperm.xlu1 %675, %v273_v14   ;;  %v441_v31 = vld [vmem:[%s997_s4] sm:$0xff]  ;;  %v263_v32 = vld [vmem:[%s994_s1 + $0x10] sm:$0xff]  ;;  %v268_v33 = vld [vmem:[%s994_s1 + $0x38] sm:$0xff] }
  0x1e   : > { %309 = vperm.xlu0 %674, %v275_v15   ;;  %289 = vperm.xlu2 %676, %v271_v28   ;;  %v264_v34 = vld [vmem:[%s994_s1 + $0x18] sm:$0xff]  ;;  %p700_p2 = por %p699_p1, %p698_p0 }
  0x1f   : > { %571 = vmatpush.xpose.msk.msra.mxu0 %vm317_vm0, %v258_v2  ;;  %604 = vmatpush.xpose.msk.msra.mxu3 %vm317_vm0, %v258_v2 }
  0x20   : > { %603 = vmatpush.xpose.msk.msra.mxu2 %vm317_vm0, %v258_v2  ;;  %p701_p3 = pnand %p700_p2, %p696_p13 }
  0x23   : > { %572 = vmatpush.xpose.msk.msra.mxu0 %vm317_vm0, %v257_v3  ;;  %606 = vmatpush.xpose.msk.msra.mxu3 %vm317_vm0, %v257_v3 }
  0x24   : > { %605 = vmatpush.xpose.msk.msra.mxu2 %vm317_vm0, %v257_v3  ;;  %v439_v3 = vld [vmem:[%s996_s3] sm:$0xff] }
  0x25   : > { %279 = vperm.xlu1 %675, %v269_v18  }
  0x26   : > { %284 = vperm.xlu0 %674, %v270_v19   ;;  %445 = vperm.xlu2 %676, %v441_v31  }
  0x27   : > { %573 = vmatpush.xpose.msk.msra.mxu0 %vm317_vm0, %v256_v4  ;;  %608 = vmatpush.xpose.msk.msra.mxu3 %vm317_vm0, %v256_v4 }
  0x28   : > { %607 = vmatpush.xpose.msk.msra.mxu2 %vm317_vm0, %v256_v4  ;;  %v440_v4 = vld [vmem:[%s996_s3 + $0x8] sm:$0xff] }
  0x2b   : > { %574 = vmatpush.xpose.msk.msra.mxu0 %vm317_vm0, %v255_v5  ;;  %610 = vmatpush.xpose.msk.msra.mxu3 %vm317_vm0, %v255_v5 }
  0x2c   : > { %609 = vmatpush.xpose.msk.msra.mxu2 %vm317_vm0, %v255_v5 }
  0x2e   : > { %450 = vperm.xlu0 %674, %v442_v22  }
  0x2f   : > { %575 = vmatpush.xpose.msk.msra.mxu0 %vm317_vm0, %v254_v6  ;;  %612 = vmatpush.xpose.msk.msra.mxu3 %vm317_vm0, %v254_v6 }
  0x30   : > { %611 = vmatpush.xpose.msk.msra.mxu2 %vm317_vm0, %v254_v6 }
  0x33   : > { %576 = vmatpush.xpose.msk.msra.mxu0 %vm317_vm0, %v253_v7  ;;  %614 = vmatpush.xpose.msk.msra.mxu3 %vm317_vm0, %v253_v7 }
  0x34   : > { %613 = vmatpush.xpose.msk.msra.mxu2 %vm317_vm0, %v253_v7 }
  0x37   : > { %577 = vmatpush.xpose.msk.msra.mxu0 %vm317_vm0, %v252_v8  ;;  %616 = vmatpush.xpose.msk.msra.mxu3 %vm317_vm0, %v252_v8 }
  0x38   : > { %615 = vmatpush.xpose.msk.msra.mxu2 %vm317_vm0, %v252_v8 }
  0x3b   : > { %578 = vmatpush.xpose.msk.msra.mxu0 %vm317_vm0, %v251_v12  ;;  %618 = vmatpush.xpose.msk.msra.mxu3 %vm317_vm0, %v251_v12 }
  0x3c   : > { %617 = vmatpush.xpose.msk.msra.mxu2 %vm317_vm0, %v251_v12 }
  0x3f   : > { %579 = vmatpush.xpose.msk.msra.mxu0 %vm317_vm0, %v250_v13  ;;  %620 = vmatpush.xpose.msk.msra.mxu3 %vm317_vm0, %v250_v13 }
  0x40   : > { %619 = vmatpush.xpose.msk.msra.mxu2 %vm317_vm0, %v250_v13 }
  0x43   : > { %580 = vmatpush.xpose.msk.msra.mxu0 %vm317_vm0, %v249_v16  ;;  %622 = vmatpush.xpose.msk.msra.mxu3 %vm317_vm0, %v249_v16 }
  0x44   : > { %621 = vmatpush.xpose.msk.msra.mxu2 %vm317_vm0, %v249_v16 }
  0x47   : > { %581 = vmatpush.xpose.msk.msra.mxu0 %vm317_vm0, %v248_v17  ;;  %624 = vmatpush.xpose.msk.msra.mxu3 %vm317_vm0, %v248_v17 }
  0x48   : > { %623 = vmatpush.xpose.msk.msra.mxu2 %vm317_vm0, %v248_v17 }
  0x4b   : > { %582 = vmatpush.xpose.msk.msra.mxu0 %vm317_vm0, %v247_v20  ;;  %626 = vmatpush.xpose.msk.msra.mxu3 %vm317_vm0, %v247_v20 }
  0x4c   : > { %625 = vmatpush.xpose.msk.msra.mxu2 %vm317_vm0, %v247_v20 }
  0x4f   : > { %583 = vmatpush.xpose.msk.msra.mxu0 %vm317_vm0, %v246_v21  ;;  %628 = vmatpush.xpose.msk.msra.mxu3 %vm317_vm0, %v246_v21 }
  0x50   : > { %627 = vmatpush.xpose.msk.msra.mxu2 %vm317_vm0, %v246_v21 }
  0x53   : > { %584 = vmatpush.xpose.msk.msra.mxu0 %vm317_vm0, %v245_v24  ;;  %630 = vmatpush.xpose.msk.msra.mxu3 %vm317_vm0, %v245_v24 }
  0x54   : > { %629 = vmatpush.xpose.msk.msra.mxu2 %vm317_vm0, %v245_v24 }
  0x56   : > { %585 = vmatmul.msk.f32.vlgmr.msra.gmra.mxu0 %vm317_vm0, %v261_v25  ;;  %590 = vmatmul.msk.f32.vlgmr.msra.gmra.mxu3 %vm317_vm0, %v266_v26 }
  0x57   : > { %589 = vmatmul.msk.f32.vlgmr.msra.gmra.mxu2 %vm317_vm0, %v265_v27 }
  0x5e   : > { %586 = vmatmul.msk.f32.gmra.mxu0 %vm317_vm0, %v262_v29  ;;  %591 = vmatmul.msk.f32.gmra.mxu3 %vm317_vm0, %v267_v30 }
  0x66   : > { %587 = vmatmul.msk.f32.gmra.mxu0 %vm317_vm0, %v263_v32  ;;  %592 = vmatmul.msk.f32.gmra.mxu3 %vm317_vm0, %v268_v33 }
  0x6e   : > { %588 = vmatmul.msk.f32.gmra.mxu0 %vm317_vm0, %v264_v34 }
  0x70   : > { %v295_v42 = vpop.permute.xlu2 %294 }
  0x78   : > { %v290_v56 = vpop.permute.xlu2 %289 }
  0x80   : > { %v446_v5 = vpop.permute.xlu2 %445 }
  0x87   : > { %v305_v38 = vpop.permute.xlu1 %304 }
  0x88   : > { %v315_v39 = vpop.permute.xlu0 %314 }
  0x8f   : > { %v300_v43 = vpop.permute.xlu1 %299 }
  0x90   : > { %v310_v44 = vpop.permute.xlu0 %309 }
  0x97   : > { %v280_v59 = vpop.permute.xlu1 %279 }
  0x98   : > { %v285_v60 = vpop.permute.xlu0 %284 }
  0xa0   : > { %v451_v8 = vpop.permute.xlu0 %450 }
  0xd3   : > { %v407_v35 = vpop.f32.mrf.mxu0 }
  0xd4   : > { %v408_v63 = vadd.f32 %v407_v35, %v280_v59 }
  0xd6   : > { %v431_v2 = vmax.f32 %v408_v63, 0.0 }
  0xd9   : > { %v422_v36 = vpop.f32.mrf.mxu3 }
  0xda   : > { %v419_v48 = vpop.f32.mrf.mxu2  ;;  %v423_v49 = vadd.f32 %v422_v36, %v305_v38 }
  0xdb   : > { %v410_v37 = vpop.f32.mrf.mxu0  ;;  %v420_v53 = vadd.f32 %v419_v48, %v300_v43 }
  0xdc   : > { %v436_v54 = vmax.f32 %v423_v49, 0.0  ;;  %v411_v61 = vadd.f32 %v410_v37, %v285_v60 }
  0xdd   : > { %v435_v58 = vmax.f32 %v420_v53, 0.0 }
  0xde   : > { %v432_v1 = vmax.f32 %v411_v61, 0.0 }
  0xe1   : > { %v425_v40 = vpop.f32.mrf.mxu3 }
  0xe2   : > { %v426_v46 = vadd.f32 %v425_v40, %v310_v44 }
  0xe3   : > { %v413_v41 = vpop.f32.mrf.mxu0 }
  0xe4   : > { %v437_v52 = vmax.f32 %v426_v46, 0.0  ;;  %v414_v57 = vadd.f32 %v413_v41, %v290_v56 }
  0xe6   : > { %v433_v0 = vmax.f32 %v414_v57, 0.0 }
  0xe9   : > { %v428_v45 = vpop.f32.mrf.mxu3 }
  0xea   : > { %v429_v47 = vadd.f32 %v428_v45, %v315_v39 }
  0xeb   : > { %v416_v51 = vpop.f32.mrf.mxu0 }
  0xec   : > { %v438_v50 = vmax.f32 %v429_v47, 0.0  ;;  %v417_v55 = vadd.f32 %v416_v51, %v295_v42 }
  0xee   : > { %468 = vmatpush.msra.mxu1 %v438_v50  ;;  %v434_v62 = vmax.f32 %v417_v55, 0.0 }
  0xf0   : > { %469 = vmatpush.msra.mxu1 %v437_v52 }
  0xf2   : > { %470 = vmatpush.msra.mxu1 %v436_v54 }
  0xf4   : > { %471 = vmatpush.msra.mxu1 %v435_v58 }
  0xf6   : > { %472 = vmatpush.msra.mxu1 %v434_v62 }
  0xf8   : > { %473 = vmatpush.msra.mxu1 %v433_v0 }
  0xfa   : > { %474 = vmatpush.msra.mxu1 %v432_v1 }
  0xfc   : > { %475 = vmatpush.msra.mxu1 %v431_v2 }
  0xfd   : > { %593 = vmatmul.msk.f32.vlgmr.msra.gmra.mxu1 %vm453_vm1, %v439_v3 }
 0x105   : > { %594 = vmatmul.msk.f32.gmra.mxu1 %vm453_vm1, %v440_v4 }
 0x17a   : > { %v477_v6 = vpop.f32.mrf.mxu1 }
 0x17b   : > { %v478_v7 = vadd.f32 %v477_v6, %v446_v5 }
 0x17d   : > { %483 = vst [vmem:[%s230_s8] sm:$0xff] %v478_v7 }
 0x182   : > { %v480_v9 = vpop.f32.mrf.mxu1 }
 0x183   : > { %v481_v10 = vadd.f32 %v480_v9, %v451_v8 }
 0x185   : > { %484 = vst [vmem:[%s230_s8 + $0x8] sm:$0xff] %v481_v10 }
 0x186   : > { %704 = shalt.err (!%p701_p3)
}
 0x187   : > { %s742_s23 = smov 128   ;;  %s743_s25 = smov 256  }
 0x188   : > { %s744_s26 = smov 8  }
 0x189   : > { %631 = dma.vmem_to_hbm [thread:$0]  (%p813_p5), %s498_s10, 256, %s500_s11, %s486_s12, %s742_s23, %s743_s25, %s744_s26  }
 0x18a PF: > { %p637_p4 = scmp.ge.s32.totalorder %s739_s21, 2  ;;  %s514_s30 = sand.u32 1, %s727_s18  }
 0x18b   : > { %s515_s6 = scalar_lea.sflag [#allocation3], %s514_s30 }
 0x18c   : > { %p634_p7 = pnand %p637_p4, %p817_p6 }
 0x18e   : > { %p635_p8 = pneg %p634_p7 }
 0x190   : > { %722 = dma.done.wait (%p635_p8), %s515_s6, 256  }
 0x191   : > { %724 = vsyncadd (%p635_p8), %s515_s6, 4294967040  ;;  %p15_p9 = scmp.ge.s32.totalorder %s800_s24, 4   ;;  %s1001_s18 = smov %s731_s19 }
 0x192   : > { %s1002_s19 = smov %s735_s20  ;;  %s1003_s20 = smov %s811_s27 }
 0x193   : > { %s1004_s21 = smov %s800_s24  ;;  %17 = sbr.rel (!%p15_p9) target bundleno = 3 (0x3), region = 75 }
 0x198   :  { %521 = vsyncpa [#allocation3], 1 }
 0x199   :  { %523 = vsyncpa [#allocation3 + $0x1], 1 }

</bundles_post_ra>
